<compile_context>
chip_gen: v6e
topology: v6e:2x2x1
jax: 0.10.0
libtpu: 0.0.40
codegen_flags: <defaults>
</compile_context>

<pallas_src>
import functools

import jax
import jax.numpy as jnp
from jax.experimental import pallas as pl
from jax.experimental.pallas import tpu as pltpu


def _round_up(x, m):
    return (x + m - 1) // m * m


def _round_down(x, m):
    return (x // m) * m


def _vmem_capacity_bytes():
    # Hardware-derived clamp (v5e/v6e: 128 MiB, v7x: 64 MiB); conservative fallback.
    try:
        return int(pltpu.get_tpu_info().vmem_capacity_bytes)
    except Exception:
        return 64 << 20


def _avg_readout_kernel(mask_ref, emb_ref, out_ref, acc_ref, rsum_ref, *,
                        n_total, tn, ragged_n, compute_dtype):
    """Grid = (m_block, n_block); N (axis 1) is the reduction axis."""
    n = pl.program_id(1)

    @pl.when(n == 0)
    def _init():
        acc_ref[...] = jnp.zeros_like(acc_ref)
        rsum_ref[...] = jnp.zeros_like(rsum_ref)

    mask_t = mask_ref[...]          # (tm, tn)  native dtype
    emb_t = emb_ref[...]            # (tn, D)   native dtype

    if ragged_n:
        # Zero the out-of-range tail of the last (partial) N tile so OOB garbage
        # never reaches the accumulators.  No-op (value-wise) on full tiles.
        base = n * tn
        col_ok = (base + jax.lax.broadcasted_iota(jnp.int32, mask_t.shape, 1)) < n_total
        row_ok = (base + jax.lax.broadcasted_iota(jnp.int32, emb_t.shape, 0)) < n_total
        mask_t = jnp.where(col_ok, mask_t, 0)
        emb_t = jnp.where(row_ok, emb_t, 0)

    # Partial mask @ emb on the MXU (bf16 inputs, f32 accumulation).
    acc_ref[...] += jnp.dot(mask_t.astype(compute_dtype),
                            emb_t.astype(compute_dtype),
                            preferred_element_type=jnp.float32)
    # Running mask row-sum in f32 (exact vsum / row_sum semantics, incl. NaN on
    # an all-zero mask row, matching the PyTorch module).
    rsum_ref[...] += jnp.sum(mask_t.astype(jnp.float32), axis=1, keepdims=True)

    @pl.when(n == pl.num_programs(1) - 1)
    def _finalize():
        global_emb = acc_ref[...] / rsum_ref[...]          # (tm, D)
        # F.normalize(p=2, dim=1): x / max(||x||, 1e-12) == x * rsqrt(max(sq, 1e-24))
        sq = jnp.sum(global_emb * global_emb, axis=1, keepdims=True)
        inv_norm = jax.lax.rsqrt(jnp.maximum(sq, 1e-24))
        out_ref[...] = (global_emb * inv_norm).astype(out_ref.dtype)


def _avg_readout_xla(emb, mask):
    """Fused XLA path for tiny problems (full f32 precision)."""
    emb32 = emb.astype(jnp.float32)
    mask32 = mask.astype(jnp.float32)
    vsum = mask32 @ emb32
    row_sum = jnp.sum(mask32, axis=1, keepdims=True)
    global_emb = vsum / row_sum
    sq = jnp.sum(global_emb * global_emb, axis=1, keepdims=True)
    return global_emb * jax.lax.rsqrt(jnp.maximum(sq, 1e-24))


@functools.partial(jax.jit, static_argnames=("tn", "compute_dtype", "force_pallas"))
def avg_readout(emb, mask, *, tn=None, compute_dtype=jnp.bfloat16, force_pallas=False):
    """emb: (N, D), mask: (M, N) -> (M, D) float32 row-wise L2-normalized weighted mean."""
    N, D = emb.shape
    M, N2 = mask.shape
    assert N == N2, "mask and emb inner dims must match"

    emb_item = jnp.dtype(emb.dtype).itemsize
    mask_item = jnp.dtype(mask.dtype).itemsize

    # Size-based dispatch: at tiny sizes the kernel launch + pipeline is pure
    # overhead and XLA's fused matmul+normalize wins.
    if not force_pallas and (N * D * emb_item + M * N * mask_item) < (512 << 10):
        return _avg_readout_xla(emb, mask)

    # ---- row (M) blocking: bounded f32 accumulator + megacore "parallel" axis ----
    if M <= 64:
        tm = M                                   # single row block (full-dim => no 8-align needed)
    else:
        acc_cap_rows = max(8, _round_down((2 << 20) // (D * 4), 8))   # acc tile <= ~2 MiB
        tm = max(8, min(256, acc_cap_rows, _round_up(pl.cdiv(M, 2), 8)))
        tm = _round_down(tm, 8)
    grid_m = pl.cdiv(M, tm)

    # ---- reduction (N) tile: derived from an ~8 MiB double-buffer budget ----
    if tn is None:
        per_col_bytes = 2 * (tm * mask_item + D * emb_item)           # 2 pipeline buffers
        tn = _round_down(max(128, min(4096, (8 << 20) // max(per_col_bytes, 1))), 128)
    tn = max(128, _round_down(int(tn), 128))
    tn = min(tn, _round_up(N, 128))
    grid_n = pl.cdiv(N, tn)
    ragged_n = (N % tn) != 0

    # ---- VMEM request: actual footprint with headroom, clamped to hardware ----
    est_vmem = (2 * (tm * tn * mask_item + tn * D * emb_item)   # double-buffered input tiles
                + 2 * tm * D * 4                                # pipelined output block (f32)
                + tm * D * 4 + tm * 128 * 4)                    # acc + rsum scratch
    vmem_limit = int(min(max(2 * est_vmem, 16 << 20), _vmem_capacity_bytes() // 2))

    cost = pl.CostEstimate(
        flops=2 * M * N * D,
        transcendentals=M,
        bytes_accessed=M * N * mask_item + grid_m * N * D * emb_item + M * D * 4,
    )

    kernel = functools.partial(_avg_readout_kernel, n_total=N, tn=tn,
                               ragged_n=ragged_n, compute_dtype=compute_dtype)

    out = pl.pallas_call(
        kernel,
        out_shape=jax.ShapeDtypeStruct((M, D), jnp.float32),
        grid_spec=pltpu.PrefetchScalarGridSpec(
            num_scalar_prefetch=0,
            grid=(grid_m, grid_n),
            in_specs=[
                pl.BlockSpec((tm, tn), lambda m, n: (m, n)),      # mask tile (native dtype)
                pl.BlockSpec((tn, D), lambda m, n: (n, 0)),       # emb tile  (native dtype)
            ],
            out_specs=pl.BlockSpec((tm, D), lambda m, n: (m, 0)),
            scratch_shapes=[
                pltpu.VMEM((tm, D), jnp.float32),                 # matmul accumulator
                pltpu.VMEM((tm, 1), jnp.float32),                 # mask row-sum accumulator
            ],
        ),
        compiler_params=pltpu.CompilerParams(
            dimension_semantics=("parallel", "arbitrary"),        # M parallel, N reduction
            vmem_limit_bytes=vmem_limit,
        ),
        cost_estimate=cost,
    )(mask, emb)
    return out


def avg_readout_ref(emb, mask):
    """Pure-JAX f32 reference mirroring the PyTorch forward."""
    vsum = mask @ emb
    row_sum = jnp.sum(mask, axis=1, keepdims=True)
    global_emb = vsum / row_sum
    norm = jnp.maximum(jnp.linalg.norm(global_emb, axis=1, keepdims=True), 1e-12)
    return global_emb / norm


def avg_readout_ref_matched(emb, mask, compute_dtype=jnp.bfloat16):
    """Reference matching the kernel's precision: bf16 matmul, f32 row-sum/accum."""
    vsum = jnp.dot(mask.astype(compute_dtype), emb.astype(compute_dtype),
                   preferred_element_type=jnp.float32)
    row_sum = jnp.sum(mask.astype(jnp.float32), axis=1, keepdims=True)
    global_emb = vsum / row_sum
    sq = jnp.sum(global_emb * global_emb, axis=1, keepdims=True)
    return global_emb * jax.lax.rsqrt(jnp.maximum(sq, 1e-24))


if __name__ == "__main__":
    key = jax.random.PRNGKey(0)

    cases = [
        # (M, N, D, tn): small shapes implied by the module (M graphs, N nodes, D hidden)
        (4, 16, 32, None),      # tiny, single ragged N tile
        (6, 300, 96, None),     # single ragged N tile, D not a multiple of 128
        (20, 1000, 160, 256),   # multi-step reduction with ragged last tile
        (80, 640, 128, 256),    # M split -> ("parallel", "arbitrary") 2x3 grid
    ]
    for (M, N, D, tn) in cases:
        key, k_emb, k_mask = jax.random.split(key, 3)
        emb = jax.random.normal(k_emb, (N, D), dtype=jnp.float32)
        # Nonnegative membership weights; rows strictly positive so row_sum > 0.
        mask = jax.random.uniform(k_mask, (M, N), dtype=jnp.float32) + 0.1

        out = jax.block_until_ready(avg_readout(emb, mask, tn=tn, force_pallas=True))
        assert out.shape == (M, D)
        assert bool(jnp.all(jnp.isfinite(out)))

        ref_matched = avg_readout_ref_matched(emb, mask)
        ref_f32 = avg_readout_ref(emb, mask)
        assert jnp.allclose(out, ref_matched, atol=2e-3, rtol=2e-3), \
            f"mismatch vs precision-matched reference at {(M, N, D, tn)}"
        assert jnp.allclose(out, ref_f32, atol=3e-2, rtol=3e-2), \
            f"mismatch vs f32 reference at {(M, N, D, tn)}"

    # Auto-dispatch: tiny problems take the plain-XLA path (full f32 precision).
    key, k_emb, k_mask = jax.random.split(key, 3)
    emb_s = jax.random.normal(k_emb, (24, 48), dtype=jnp.float32)
    mask_s = jax.random.uniform(k_mask, (3, 24), dtype=jnp.float32) + 0.1
    out_s = jax.block_until_ready(avg_readout(emb_s, mask_s))
    assert jnp.allclose(out_s, avg_readout_ref(emb_s, mask_s), atol=1e-4, rtol=1e-4)

    print("KERNEL_OK")
</pallas_src>

<mosaic_0001>
module attributes {stable_mosaic.version = 11 : i64} {
  func.func @_avg_readout_kernel(%arg0: i32, %arg1: i32, %arg2: memref<4x128xf32, #tpu.memory_space<vmem>>, %arg3: memref<128x32xf32, #tpu.memory_space<vmem>>, %arg4: memref<4x32xf32, #tpu.memory_space<vmem>>, %arg5: memref<4x32xf32, #tpu.memory_space<vmem>>, %arg6: memref<4x1xf32, #tpu.memory_space<vmem>>) attributes {dimension_semantics = [#tpu.dimension_semantics<parallel>, #tpu.dimension_semantics<arbitrary>], iteration_bounds = array<i64: 1, 1>, scalar_prefetch = 0 : i64, scratch_operands = 2 : i64, tpu.core_type = #tpu.core_type<tc>, window_params = [{transform_indices = @transform_0, window_bounds = array<i64: 4, 128>}, {transform_indices = @transform_1, window_bounds = array<i64: 128, 32>}, {transform_indices = @transform_2, window_bounds = array<i64: 4, 32>}]} {
    %c0_i32 = arith.constant 0 : i32
    %0 = arith.cmpi eq, %arg1, %c0_i32 : i32
    %1 = arith.extui %0 : i1 to i32
    %c0_i32_0 = arith.constant 0 : i32
    %2 = arith.cmpi ne, %1, %c0_i32_0 : i32
    scf.if %2 {
      %cst_18 = arith.constant 0.000000e+00 : f32
      %36 = vector.broadcast %cst_18 : f32 to vector<4x32xf32>
      %c0_19 = arith.constant 0 : index
      %c0_20 = arith.constant 0 : index
      %37 = vector.load %arg5[%c0_19, %c0_20] : memref<4x32xf32, #tpu.memory_space<vmem>>, vector<4x32xf32>
      tpu.vector_store %arg5[%c0_19, %c0_20], %36 {strides = array<i32>} : memref<4x32xf32, #tpu.memory_space<vmem>>, vector<4x32xf32>,
      %cst_21 = arith.constant 0.000000e+00 : f32
      %38 = vector.broadcast %cst_21 : f32 to vector<4x1xf32>
      %c0_22 = arith.constant 0 : index
      %c0_23 = arith.constant 0 : index
      %39 = vector.load %arg6[%c0_22, %c0_23] : memref<4x1xf32, #tpu.memory_space<vmem>>, vector<4x1xf32>
      tpu.vector_store %arg6[%c0_22, %c0_23], %38 {strides = array<i32>} : memref<4x1xf32, #tpu.memory_space<vmem>>, vector<4x1xf32>,
    } else {
    }
    %c0 = arith.constant 0 : index
    %c0_1 = arith.constant 0 : index
    %3 = vector.load %arg2[%c0, %c0_1] : memref<4x128xf32, #tpu.memory_space<vmem>>, vector<4x128xf32>
    %c0_2 = arith.constant 0 : index
    %c0_3 = arith.constant 0 : index
    %4 = vector.load %arg3[%c0_2, %c0_3] : memref<128x32xf32, #tpu.memory_space<vmem>>, vector<128x32xf32>
    %c128_i32 = arith.constant 128 : i32
    %5 = arith.muli %arg1, %c128_i32 : i32
    %6 = tpu.iota {dimensions = array<i32: 1>} : vector<4x128xi32>
    %7 = vector.broadcast %5 : i32 to vector<4x128xi32>
    %8 = arith.addi %7, %6 : vector<4x128xi32>
    %c16_i32 = arith.constant 16 : i32
    %9 = vector.broadcast %c16_i32 : i32 to vector<4x128xi32>
    %10 = arith.cmpi slt, %8, %9 : vector<4x128xi32>
    %11 = tpu.iota {dimensions = array<i32: 0>} : vector<128x32xi32>
    %12 = vector.broadcast %5 : i32 to vector<128x32xi32>
    %13 = arith.addi %12, %11 : vector<128x32xi32>
    %c16_i32_4 = arith.constant 16 : i32
    %14 = vector.broadcast %c16_i32_4 : i32 to vector<128x32xi32>
    %15 = arith.cmpi slt, %13, %14 : vector<128x32xi32>
    %c0_i32_5 = arith.constant 0 : i32
    %16 = arith.sitofp %c0_i32_5 : i32 to f32
    %17 = vector.broadcast %16 : f32 to vector<4x128xf32>
    %18 = arith.select %10, %3, %17 : vector<4x128xi1>, vector<4x128xf32>
    %c0_i32_6 = arith.constant 0 : i32
    %19 = arith.sitofp %c0_i32_6 : i32 to f32
    %20 = vector.broadcast %19 : f32 to vector<128x32xf32>
    %21 = arith.select %15, %4, %20 : vector<128x32xi1>, vector<128x32xf32>
    %c0_7 = arith.constant 0 : index
    %c0_8 = arith.constant 0 : index
    %22 = vector.load %arg5[%c0_7, %c0_8] : memref<4x32xf32, #tpu.memory_space<vmem>>, vector<4x32xf32>
    %23 = arith.truncf %18 : vector<4x128xf32> to vector<4x128xbf16>
    %24 = arith.truncf %21 : vector<128x32xf32> to vector<128x32xbf16>
    %cst = arith.constant dense<0.000000e+00> : vector<4x32xf32>
    %25 = tpu.matmul %23, %24, %cst {dimension_numbers = #tpu.dot_dimension_numbers<[1], [0], [0], [1], [0, 0, 1, 1], [], []>} : vector<4x128xbf16>, vector<128x32xbf16>, vector<4x32xf32> -> vector<4x32xf32>
    %26 = arith.addf %22, %25 : vector<4x32xf32>
    %c0_9 = arith.constant 0 : index
    %c0_10 = arith.constant 0 : index
    %27 = vector.load %arg5[%c0_9, %c0_10] : memref<4x32xf32, #tpu.memory_space<vmem>>, vector<4x32xf32>
    tpu.vector_store %arg5[%c0_9, %c0_10], %26 {strides = array<i32>} : memref<4x32xf32, #tpu.memory_space<vmem>>, vector<4x32xf32>,
    %c0_11 = arith.constant 0 : index
    %c0_12 = arith.constant 0 : index
    %28 = vector.load %arg6[%c0_11, %c0_12] : memref<4x1xf32, #tpu.memory_space<vmem>>, vector<4x1xf32>
    %cst_13 = arith.constant dense<0.000000e+00> : vector<4xf32>
    %29 = vector.multi_reduction <add>, %18, %cst_13 [1] : vector<4x128xf32> to vector<4xf32>
    %30 = vector.shape_cast %29 : vector<4xf32> to vector<4x1xf32>
    %31 = arith.addf %28, %30 : vector<4x1xf32>
    %c0_14 = arith.constant 0 : index
    %c0_15 = arith.constant 0 : index
    %32 = vector.load %arg6[%c0_14, %c0_15] : memref<4x1xf32, #tpu.memory_space<vmem>>, vector<4x1xf32>
    tpu.vector_store %arg6[%c0_14, %c0_15], %31 {strides = array<i32>} : memref<4x1xf32, #tpu.memory_space<vmem>>, vector<4x1xf32>,
    %c0_i32_16 = arith.constant 0 : i32
    %33 = arith.cmpi eq, %arg1, %c0_i32_16 : i32
    %34 = arith.extui %33 : i1 to i32
    %c0_i32_17 = arith.constant 0 : i32
    %35 = arith.cmpi ne, %34, %c0_i32_17 : i32
    scf.if %35 {
      %c0_18 = arith.constant 0 : index
      %c0_19 = arith.constant 0 : index
      %36 = vector.load %arg5[%c0_18, %c0_19] : memref<4x32xf32, #tpu.memory_space<vmem>>, vector<4x32xf32>
      %c0_20 = arith.constant 0 : index
      %c0_21 = arith.constant 0 : index
      %37 = vector.load %arg6[%c0_20, %c0_21] : memref<4x1xf32, #tpu.memory_space<vmem>>, vector<4x1xf32>
      %38 = vector.broadcast %37 : vector<4x1xf32> to vector<4x32xf32>
      %39 = arith.divf %36, %38 : vector<4x32xf32>
      %40 = arith.mulf %39, %39 : vector<4x32xf32>
      %cst_22 = arith.constant dense<0.000000e+00> : vector<4xf32>
      %41 = vector.multi_reduction <add>, %40, %cst_22 [1] : vector<4x32xf32> to vector<4xf32>
      %42 = vector.shape_cast %41 : vector<4xf32> to vector<4x1xf32>
      %cst_23 = arith.constant 1.000000e-24 : f32
      %43 = vector.broadcast %cst_23 : f32 to vector<4x1xf32>
      %44 = arith.maximumf %42, %43 : vector<4x1xf32>
      %45 = math.rsqrt %44 : vector<4x1xf32>
      %46 = vector.broadcast %45 : vector<4x1xf32> to vector<4x32xf32>
      %47 = arith.mulf %39, %46 : vector<4x32xf32>
      %c0_24 = arith.constant 0 : index
      %c0_25 = arith.constant 0 : index
      %48 = vector.load %arg4[%c0_24, %c0_25] : memref<4x32xf32, #tpu.memory_space<vmem>>, vector<4x32xf32>
      tpu.vector_store %arg4[%c0_24, %c0_25], %47 {strides = array<i32>} : memref<4x32xf32, #tpu.memory_space<vmem>>, vector<4x32xf32>,
    } else {
    }
    return
  }
  func.func @transform_0(%arg0: i32, %arg1: i32) -> (i32, i32) {
    %c0_i32 = arith.constant 0 : i32
    return %arg0, %arg1 : i32, i32
  }
  func.func @transform_1(%arg0: i32, %arg1: i32) -> (i32, i32) {
    %c0_i32 = arith.constant 0 : i32
    %c0_i32_0 = arith.constant 0 : i32
    return %arg1, %c0_i32 : i32, i32
  }
  func.func @transform_2(%arg0: i32, %arg1: i32) -> (i32, i32) {
    %c0_i32 = arith.constant 0 : i32
    %c0_i32_0 = arith.constant 0 : i32
    return %arg0, %c0_i32 : i32, i32
  }
}

</mosaic_0001>

<bundles_post_ra>
// kernel: avg_readout.1
= control target key start
LH: loop header
LB: loop body
LE: loop exit
PB: predicated region body
PF: predicated region fallthrough
CT: control target
= control target key end

     0   :  { %7 = vsyncpa [#allocation5], 0  ;;  %s361_s0 = inlined_call_operand.hbm [shape: f32[4,16], index: 0, kind: input, shape index: {}]   ;;  %s362_s1 = inlined_call_operand.hbm [shape: f32[16,32], index: 1, kind: input, shape index: {}]   ;;  %s363_s2 = inlined_call_operand.hbm [shape: f32[4,32], index: 2, kind: output, shape index: {}]  }
   0x1   :  { %8 = vsyncpa [#allocation8], 0 }
   0x2   :  { %9 = vsyncpa [#allocation6], 0  ;;  %s323_s9 = smov [#allocation4]  }
   0x3   :  { %s16_s10 = sshll.u32 %s323_s9, 4  ;;  %s17_s10 = int_to_ptr.vmem [resolvable:$true] %s16_s10 }
   0x4   :  { %s265_s11 = scalar_lea.vmem %s17_s10, 64  ;;  %p270_p1 = scmp.lt.s32.totalorder %s17_s10, %s17_s10 }
   0x5   :  { %p266_p0 = scmp.ne.s32.totalorder %s17_s10, %s265_s11  ;;  %p271_p2 = scmp.lt.s32.totalorder %s265_s11, %s265_s11 }
   0x7   :  { %p272_p3 = por %p271_p2, %p270_p1 }
   0x9   :  { %p273_p4 = pnand %p272_p3, %p266_p0 }
   0xb   :  { %276 = shalt.err (!%p273_p4)
}
   0xc   :  { %19 = dma.hbm_to_vmem [thread:$0]  %s361_s0, 64, %s17_s10, [#allocation5]  }
   0xd   :  { %24 = vsyncadd [#allocation8], 1792  ;;  %s324_s14 = smov [#allocation7]  }
   0xe   :  { %s25_s15 = sshll.u32 %s324_s14, 4  ;;  %s26_s15 = int_to_ptr.vmem [resolvable:$true] %s25_s15 }
   0xf   :  { %s285_s16 = scalar_lea.vmem %s26_s15, 256  ;;  %s289_s17 = scalar_lea.vmem %s26_s15, 2048 }
  0x10   :  { %p286_p5 = scmp.ne.s32.totalorder %s26_s15, %s285_s16  ;;  %p290_p6 = scmp.lt.s32.totalorder %s26_s15, %s26_s15 }
  0x11   :  { %p291_p7 = scmp.lt.s32.totalorder %s289_s17, %s285_s16 }
  0x13   :  { %p292_p8 = por %p291_p7, %p290_p6 }
  0x15   :  { %p293_p9 = pnand %p292_p8, %p286_p5 }
  0x17   :  { %296 = shalt.err (!%p293_p9)
}
  0x18   :  { %s325_s18 = smov 128   ;;  %s326_s19 = smov 8  }
  0x19   :  { %31 = dma.hbm_to_vmem [thread:$0]  %s362_s1, 256, %s26_s15, [#allocation8], %s325_s18, %s325_s18, %s326_s19  }
  0x1a   :  { %317 = dma.done.wait [#allocation5], 64  }
  0x1b   :  { %318 = vsyncadd [#allocation5], 4294967232 }
  0x1c   :  { %319 = dma.done.wait [#allocation8], 2048  }
  0x1d   :  { %320 = vsyncadd [#allocation8], 4294965248  ;;  %v65_v0 = vlaneseq  ;;  %vm45_vm0 = vcmask 3072   ;;  %v327_v1 = vmov 0.0   ;;  %vm328_vm1 = vmmov 0   ;;  %v48_v4 = vld [vmem:[#allocation7] sm:$0xff] }
  0x1e   :  { %46 = vst.msk [vmem:[#allocation3] sm:$0xf] %vm45_vm0, %v327_v1  ;;  %238 = vmatprep.subr.bf16.mxu0 %v327_v1  ;;  %240 = vmatprep.mubr.msk.bf16.mxu0 %vm328_vm1, %v327_v1  ;;  %vm190_vm3 = vcmask 1043456   ;;  %v47_v3 = vld [vmem:[#allocation4] sm:$0xf]  ;;  %v49_v5 = vld [vmem:[#allocation7 + $0x8] sm:$0xff] }
  0x1f   :  { %v66_v2 = vand.u32 127, %v65_v0  ;;  %v138_v7 = vpack.c.bf16 %v49_v5, %v48_v4  ;;  %v234_v8 = vpack.c.bf16 %v47_v3, %v47_v3  ;;  %v329_v10 = vmov 0   ;;  %s330_s0 = smov [#allocation9]  }
  0x20   :  { %252 = vset.pattern.permute.xlu0 %v329_v10  ;;  %vm43_vm5 = vcmask 257024   ;;  %s223_s1 = sshll.u32 %s330_s0, 4  ;;  %s224_s1 = int_to_ptr.vmem [resolvable:$true] %s223_s1 }
  0x21   :  { %vm69_vm2 = vcmp.lt.s32.totalorder %v66_v2, 16  ;;  %239 = vmatpush3.bf16.msra.mxu0 %v138_v7  ;;  %44 = vst.msk [vmem:[#allocation2] sm:$0xf] %vm43_vm5, %v327_v1  ;;  %s297_s22 = scalar_lea.vmem %s224_s1, 64  ;;  %p302_p11 = scmp.lt.s32.totalorder %s224_s1, %s224_s1 }
  0x22   :  { %v119_v6 = vsel %vm69_vm2, %v47_v3, 0.0  ;;  %vm233_vm4 = vmpackc.low %vm69_vm2, %vm69_vm2  ;;  %p298_p10 = scmp.ne.s32.totalorder %s224_s1, %s297_s22  ;;  %p303_p12 = scmp.lt.s32.totalorder %s297_s22, %s297_s22 }
  0x23   :  { %v191_v9 = vsel %vm190_vm3, %v119_v6, 0.0 }
  0x24   :  { %192 = vadd.xlane.f32.xlu0 %v191_v9  ;;  %241 = vmatmul.mubr.msk.bf16.vlgmr.msra.gmra.mxu0 %vm233_vm4, %v234_v8  ;;  %p304_p13 = por %p303_p12, %p302_p11 }
  0x25   :  { %v189_v11 = vld [vmem:[#allocation3] sm:$0xf] }
  0x26   :  { %p305_p0 = pnand %p304_p13, %p298_p10 }
  0x28   :  { %v136_v15 = vld [vmem:[#allocation2] sm:$0xf] }
  0xad   :  { %v193_v12 = vpop.xlane.xlu0 %192 }
  0xae   :  { %v194_v13 = vadd.f32 %v193_v12, %v189_v11 }
  0xb0   :  { %196 = vst.msk [vmem:[#allocation3] sm:$0xf] %vm45_vm0, %v194_v13 }
  0xb7   :  { %v201_v14 = vld [vmem:[#allocation3] sm:$0xf] }
  0xb8   :  { %204 = vperm.xlu0 %252, %v201_v14  }
  0xe4   :  { %v180_v16 = vpop.f32.mrf.mxu0 }
  0xe5   :  { %v186_v17 = vadd.f32 %v180_v16, %v136_v15 }
  0xe6   :  { %v242_v18 = vpop.f32.mrf.mxu0 }
  0xe7   :  { %188 = vst.msk [vmem:[#allocation2] sm:$0xf] %vm43_vm5, %v186_v17 }
  0xe8   :  { %v183_v19 = vpop.f32.mrf.mxu0 }
  0xea   :  { %v243_v20 = vpop.f32.mrf.mxu0 }
  0xee   :  { %v200_v22 = vld [vmem:[#allocation2] sm:$0xf] }
 0x133   :  { %v205_v21 = vpop.permute.xlu0 %204 }
 0x134   :  { %253 = vrcp.f32 %v205_v21 }
 0x141   :  { %v254_v23 = vpop.eup %253 }
 0x142   :  { %v208_v24 = vmul.f32 %v254_v23, %v200_v22 }
 0x144   :  { %v209_v25 = vmul.f32 %v208_v24, %v208_v24 }
 0x146   :  { %v210_v26 = vsel %vm43_vm5, %v209_v25, 0.0 }
 0x147   :  { %211 = vadd.xlane.f32.xlu1 %v210_v26 }
 0x1d0   :  { %v212_v27 = vpop.xlane.xlu1 %211 }
 0x1d1   :  { %v213_v28 = vmax.f32 %v212_v27, 1e-24 }
 0x1d3   :  { %255 = vrsqrt.f32 %v213_v28 }
 0x1e0   :  { %v256_v29 = vpop.eup %255 }
 0x1e1   :  { %v215_v30 = vmul.f32 %v256_v29, %v208_v24 }
 0x1e3   :  { %216 = vst.msk [vmem:[#allocation9] sm:$0xf] %vm43_vm5, %v215_v30 }
 0x1e4   :  { %308 = shalt.err (!%p305_p0)
}
 0x1e5   :  { %226 = dma.vmem_to_hbm [thread:$0]  %s224_s1, 64, %s363_s2, [#allocation6]  }
 0x1e6   :  { %321 = dma.done.wait [#allocation6], 64  }
 0x1e7   :  { %322 = vsyncadd [#allocation6], 4294967232 }
 0x1e8   :  { %230 = vsyncpa [#allocation5], 1 }
 0x1e9   :  { %231 = vsyncpa [#allocation8], 1 }
 0x1ea   :  { %232 = vsyncpa [#allocation6], 1 }

</bundles_post_ra>
